<compile_context>
chip_gen: v7x
topology: tpu7x:2x2x1
jax: 0.10.0
libtpu: 0.0.40
codegen_flags: <defaults>
</compile_context>

<pallas_src>
import functools

import jax
import jax.numpy as jnp
from jax import lax
from jax.experimental import pallas as pl
from jax.experimental.pallas import tpu as pltpu


def _vmem_capacity_bytes():
    """Per-core VMEM capacity guess (conservative for unknown generations)."""
    try:
        kind = jax.devices()[0].device_kind.lower()
    except Exception:
        return 64 << 20
    if ("v4" in kind) or ("v5" in kind) or ("v6" in kind):
        return 128 << 20
    return 64 << 20          # v7x and unknown chips: 64 MiB per TensorCore


# ---------------------------------------------------------------------------
# Fast path: whole tensor resident in VMEM — reduce + rescale in one kernel.
# One HBM read of x, one HBM write of the output.
# ---------------------------------------------------------------------------
def _fused_minmax_scale_kernel(x_ref, o_ref, *, out_min, out_max):
    xf = x_ref[...].astype(jnp.float32)
    in_min = jnp.min(xf)
    in_max = jnp.max(xf)
    a = (out_max - out_min) / (in_max - in_min)
    b = out_min - a * in_min
    o_ref[...] = (xf * a + b).astype(o_ref.dtype)


# ---------------------------------------------------------------------------
# Tiled pass 1: per-core partial (min, max) with an (8, lanes) block-resident
# accumulator.  Grid = (num_core_splits, steps_per_core); the leading axis is
# "parallel" (megacore) and each core writes its own output block, so the
# reduction is race-free on 1-TC and 2-TC chips alike.
# ---------------------------------------------------------------------------
def _partial_minmax_kernel(x_ref, pmin_ref, pmax_ref, *,
                           tile_rows, lanes, valid_rows_last):
    c = pl.program_id(0)
    s = pl.program_id(1)
    xf = x_ref[...].astype(jnp.float32)                   # (tile_rows, lanes)

    if valid_rows_last != tile_rows:
        # Only the globally-last block extends past the array; Pallas pads it
        # with unspecified data, so mask those rows with +/-inf sentinels.
        is_last = jnp.logical_and(c == pl.num_programs(0) - 1,
                                  s == pl.num_programs(1) - 1)
        row = lax.broadcasted_iota(jnp.int32, xf.shape, 0)
        valid = jnp.logical_or(jnp.logical_not(is_last), row < valid_rows_last)
        x_min = jnp.where(valid, xf, jnp.inf)
        x_max = jnp.where(valid, xf, -jnp.inf)
    else:
        x_min = xf
        x_max = xf

    # Fold sublane groups with pure VPU mins/maxes -> ~1 vld per input vreg;
    # the (8, lanes) partial stays resident in the output VMEM block.
    g = tile_rows // 8
    t_min = jnp.min(x_min.reshape(g, 8, lanes), axis=0)
    t_max = jnp.max(x_max.reshape(g, 8, lanes), axis=0)

    @pl.when(s == 0)
    def _():
        pmin_ref[0] = t_min
        pmax_ref[0] = t_max

    @pl.when(s > 0)
    def _():
        pmin_ref[0] = jnp.minimum(pmin_ref[0], t_min)
        pmax_ref[0] = jnp.maximum(pmax_ref[0], t_max)


# ---------------------------------------------------------------------------
# Tiled pass 2: fused affine rescale, o = a * x + b (a, b resident in SMEM).
# ---------------------------------------------------------------------------
def _affine_kernel(ab_ref, x_ref, o_ref):
    a = ab_ref[0]
    b = ab_ref[1]
    o_ref[...] = (x_ref[...].astype(jnp.float32) * a + b).astype(o_ref.dtype)


def min_max_scaling(x, out_range=(-1.0, 1.0), use_fused_fast_path=True):
    """Pallas implementation of min_max_scaling.forward (in_range=None case)."""
    out_min = float(min(out_range))
    out_max = float(max(out_range))

    orig_shape = x.shape
    orig_dtype = x.dtype
    # PyTorch's op returns a float tensor; keep float dtypes, promote ints.
    out_dtype = orig_dtype if jnp.issubdtype(orig_dtype, jnp.floating) else jnp.float32

    total = int(x.size)
    if total == 0:
        return jnp.zeros(orig_shape, out_dtype)

    flat = x.reshape(-1)

    # ---- Lane-dense 2D view; no host pad whenever total % 128 == 0 --------
    lanes = 0
    for k in range(8, 0, -1):
        if total % (128 * k) == 0:
            lanes = 128 * k
            break
    if lanes == 0:
        # Sub-128-element ragged tail: minimal host pad with the first element
        # so the global min/max are unchanged; output is sliced back below.
        # TODO(synk): mask this tail in-kernel too and drop the copy entirely.
        lanes = 128
        padded_total = -(-total // lanes) * lanes
        pad = jnp.full((padded_total - total,), flat[0], dtype=orig_dtype)
        flat = jnp.concatenate([flat, pad])
    else:
        padded_total = total

    rows = padded_total // lanes
    x2 = flat.reshape(rows, lanes)

    f32_bytes = padded_total * 4
    vmem_budget = max(min(_vmem_capacity_bytes() - (16 << 20), 96 << 20), 32 << 20)

    # ---- VMEM-resident fast path (typical image tensors) -------------------
    # Budget ~6x the f32 footprint: in + out (possibly double-buffered) plus
    # in-kernel f32 temporaries.
    if rows < 8 or (use_fused_fast_path and 6 * f32_bytes <= vmem_budget):
        out2 = pl.pallas_call(
            functools.partial(_fused_minmax_scale_kernel,
                              out_min=out_min, out_max=out_max),
            out_shape=jax.ShapeDtypeStruct((rows, lanes), out_dtype),
            grid=(1,),
            in_specs=[pl.BlockSpec((rows, lanes), lambda i: (0, 0))],
            out_specs=pl.BlockSpec((rows, lanes), lambda i: (0, 0)),
            compiler_params=pltpu.CompilerParams(
                vmem_limit_bytes=vmem_budget),
        )(x2)
    else:
        # ---- Tiled two-pass streaming path ---------------------------------
        # ~2 MiB f32 blocks: near the HBM roofline, amortize the per-grid-step
        # overhead, still comfortably double-buffered on every generation.
        target_rows = max(8, ((512 * 1024) // lanes) // 8 * 8)
        tile_rows = min(target_rows, (rows // 8) * 8)
        steps_total = -(-rows // tile_rows)
        valid_rows_last = rows - (steps_total - 1) * tile_rows

        # Split pass 1 across TensorCores when the step count divides evenly
        # (no-op on 1-TC chips; ~2x pass-1 throughput on v7x megacore).
        nc = 2 if (steps_total % 2 == 0) else 1
        steps_per_core = steps_total // nc

        pmin, pmax = pl.pallas_call(
            functools.partial(_partial_minmax_kernel, tile_rows=tile_rows,
                              lanes=lanes, valid_rows_last=valid_rows_last),
            out_shape=(jax.ShapeDtypeStruct((nc, 8, lanes), jnp.float32),
                       jax.ShapeDtypeStruct((nc, 8, lanes), jnp.float32)),
            grid=(nc, steps_per_core),
            in_specs=[pl.BlockSpec(
                (tile_rows, lanes),
                lambda c, s: (c * steps_per_core + s, 0))],
            out_specs=(pl.BlockSpec((1, 8, lanes), lambda c, s: (c, 0, 0)),
                       pl.BlockSpec((1, 8, lanes), lambda c, s: (c, 0, 0))),
            compiler_params=pltpu.CompilerParams(
                dimension_semantics=("parallel", "arbitrary"),
                vmem_limit_bytes=32 << 20),
        )(x2)

        # Combine the tiny per-core partials and fold min/max into affine:
        #   a = (out_max - out_min) / (in_max - in_min),  b = out_min - a*in_min
        in_min = jnp.min(pmin)
        in_max = jnp.max(pmax)
        a = (out_max - out_min) / (in_max - in_min)
        ab = jnp.stack([a, out_min - a * in_min]).astype(jnp.float32)

        # Pass 2: o = a*x + b, purely mem-bound streaming, megacore-parallel.
        # TODO(synk): sweep pipeline_mode=pl.Buffered(3) on v7x if DMA shows
        # exposed bubbles at step boundaries.
        out2 = pl.pallas_call(
            _affine_kernel,
            out_shape=jax.ShapeDtypeStruct((rows, lanes), out_dtype),
            grid=(steps_total,),
            in_specs=[
                pl.BlockSpec(memory_space=pltpu.SMEM),               # (2,) a,b
                pl.BlockSpec((tile_rows, lanes), lambda i: (i, 0)),  # data
            ],
            out_specs=pl.BlockSpec((tile_rows, lanes), lambda i: (i, 0)),
            compiler_params=pltpu.CompilerParams(
                dimension_semantics=("parallel",),
                vmem_limit_bytes=32 << 20),
        )(ab, x2)

    out_flat = out2.reshape(-1)
    if padded_total != total:
        out_flat = out_flat[:total]
    return out_flat.reshape(orig_shape)


if __name__ == "__main__":
    key = jax.random.PRNGKey(0)
    k1, k2, k3 = jax.random.split(key, 3)

    def ref_min_max(t, out_range=(-1.0, 1.0)):
        omin, omax = float(min(out_range)), float(max(out_range))
        in_min = jnp.min(t)
        in_max = jnp.max(t)
        return (omax - omin) * (t - in_min) / (in_max - in_min) + omin

    # 1) Small NCHW image tensor -> VMEM-resident fused fast path.
    x1 = jax.random.uniform(k1, (2, 4, 16, 16), jnp.float32,
                            minval=-3.0, maxval=5.0)
    y1 = jax.block_until_ready(min_max_scaling(x1, out_range=(-1.0, 1.0)))
    assert y1.shape == x1.shape and y1.dtype == x1.dtype
    assert jnp.allclose(y1, ref_min_max(x1), atol=1e-5, rtol=1e-5), "fast path mismatch"

    # 2) Unaligned element count (sub-128 tail pad path, still fast path).
    x2 = jax.random.normal(k2, (3, 5, 7, 11), jnp.float32)   # 1155 elements
    y2 = jax.block_until_ready(min_max_scaling(x2, out_range=(0.0, 1.0)))
    assert y2.shape == x2.shape and y2.dtype == x2.dtype
    assert jnp.allclose(y2, ref_min_max(x2, (0.0, 1.0)), atol=1e-5, rtol=1e-5), \
        "unaligned-tail path mismatch"

    # 3) Tiled two-pass streaming path (multi-step grid, 2-core split of the
    #    pass-1 reduction, ragged last block masked in-kernel).
    x3 = jax.random.uniform(k3, (2, 3, 300, 1024), jnp.float32,
                            minval=-2.0, maxval=7.0)
    y3 = jax.block_until_ready(min_max_scaling(x3, use_fused_fast_path=False))
    assert y3.shape == x3.shape and y3.dtype == x3.dtype
    assert jnp.allclose(y3, ref_min_max(x3), atol=1e-5, rtol=1e-5), "tiled path mismatch"

    print("KERNEL_OK")
</pallas_src>

<mosaic_0001>
module attributes {stable_mosaic.version = 11 : i64} {
  func.func @_fused_minmax_scale_kernel(%arg0: i32, %arg1: memref<2x1024xf32, #tpu.memory_space<vmem>>, %arg2: memref<2x1024xf32, #tpu.memory_space<vmem>>) attributes {dimension_semantics = [#tpu.dimension_semantics<arbitrary>], iteration_bounds = array<i64: 1>, scalar_prefetch = 0 : i64, scratch_operands = 0 : i64, tpu.core_type = #tpu.core_type<tc>, window_params = [{pipeline_mode = #tpu.pipeline_mode<synchronous>, transform_indices = @transform_0, window_bounds = array<i64: 2, 1024>}, {pipeline_mode = #tpu.pipeline_mode<synchronous>, transform_indices = @transform_1, window_bounds = array<i64: 2, 1024>}]} {
    %c0 = arith.constant 0 : index
    %c0_0 = arith.constant 0 : index
    %0 = vector.load %arg1[%c0, %c0_0] : memref<2x1024xf32, #tpu.memory_space<vmem>>, vector<2x1024xf32>
    %1 = vector.shape_cast %0 : vector<2x1024xf32> to vector<1x2x1024xf32>
    %cst = arith.constant dense<0x7F800000> : vector<1xf32>
    %2 = vector.multi_reduction <minimumf>, %1, %cst [1, 2] : vector<1x2x1024xf32> to vector<1xf32>
    %3 = vector.shape_cast %2 : vector<1xf32> to vector<1x1x1xf32>
    %4 = vector.extract %3[0, 0, 0] : f32 from vector<1x1x1xf32>
    %5 = vector.shape_cast %0 : vector<2x1024xf32> to vector<1x2x1024xf32>
    %cst_1 = arith.constant dense<0xFF800000> : vector<1xf32>
    %6 = vector.multi_reduction <maximumf>, %5, %cst_1 [1, 2] : vector<1x2x1024xf32> to vector<1xf32>
    %7 = vector.shape_cast %6 : vector<1xf32> to vector<1x1x1xf32>
    %8 = vector.extract %7[0, 0, 0] : f32 from vector<1x1x1xf32>
    %9 = arith.subf %8, %4 : f32
    %cst_2 = arith.constant 2.000000e+00 : f32
    %10 = arith.divf %cst_2, %9 : f32
    %11 = arith.mulf %10, %4 : f32
    %cst_3 = arith.constant -1.000000e+00 : f32
    %12 = arith.subf %cst_3, %11 : f32
    %13 = vector.broadcast %10 : f32 to vector<2x1024xf32>
    %14 = arith.mulf %0, %13 : vector<2x1024xf32>
    %15 = vector.broadcast %12 : f32 to vector<2x1024xf32>
    %16 = arith.addf %14, %15 : vector<2x1024xf32>
    %c0_4 = arith.constant 0 : index
    %c0_5 = arith.constant 0 : index
    %17 = vector.load %arg2[%c0_4, %c0_5] : memref<2x1024xf32, #tpu.memory_space<vmem>>, vector<2x1024xf32>
    tpu.vector_store %arg2[%c0_4, %c0_5], %16 {strides = array<i32>} : memref<2x1024xf32, #tpu.memory_space<vmem>>, vector<2x1024xf32>,
    return
  }
  func.func @transform_0(%arg0: i32) -> (i32, i32) {
    %c0_i32 = arith.constant 0 : i32
    %c0_i32_0 = arith.constant 0 : i32
    %c0_i32_1 = arith.constant 0 : i32
    return %c0_i32, %c0_i32_0 : i32, i32
  }
  func.func @transform_1(%arg0: i32) -> (i32, i32) {
    %c0_i32 = arith.constant 0 : i32
    %c0_i32_0 = arith.constant 0 : i32
    %c0_i32_1 = arith.constant 0 : i32
    return %c0_i32, %c0_i32_0 : i32, i32
  }
}

</mosaic_0001>

<bundles_post_ra>
// kernel: tpu_custom_call.1
= control target key start
LH: loop header
LB: loop body
LE: loop exit
PB: predicated region body
PF: predicated region fallthrough
CT: control target
= control target key end

     0   :  { %6 = vsyncpa [#allocation3], 0  ;;  %s272_s0 = inlined_call_operand.hbm [shape: f32[2,1024], index: 0, kind: input, shape index: {}]   ;;  %s273_s1 = inlined_call_operand.hbm [shape: f32[2,1024], index: 1, kind: output, shape index: {}]  }
   0x1   :  { %7 = vsyncpa [#allocation4], 0  ;;  %s207_s6 = smov [#allocation2]   ;;  %s159_s10 = scalar_lea.hbm %s272_s0, 256 }
   0x2   :  { %s14_s7 = sshll.u32 %s207_s6, 4  ;;  %p160_p0 = scmp.ne.s32.totalorder %s272_s0, %s159_s10  ;;  %s15_s7 = int_to_ptr.vmem [resolvable:$true] %s14_s7 }
   0x3   :  { %p163_p1 = scmp.lt.u32.totalorder %s159_s10, %s272_s0 }
   0x5   :  { %p165_p2 = pnand %p163_p1, %p160_p0 }
   0x7   :  { %168 = shalt.err (!%p165_p2)
}
   0x8   :  { %s169_s15 = scalar_lea.vmem %s15_s7, 256  ;;  %p174_p4 = scmp.lt.s32.totalorder %s15_s7, %s15_s7 }
   0x9   :  { %p170_p3 = scmp.ne.s32.totalorder %s15_s7, %s169_s15  ;;  %p175_p5 = scmp.lt.s32.totalorder %s169_s15, %s169_s15 }
   0xb   :  { %p176_p6 = por %p175_p5, %p174_p4 }
   0xd   :  { %p177_p7 = pnand %p176_p6, %p170_p3 }
   0xf   :  { %180 = shalt.err (!%p177_p7)
}
  0x10   :  { %17 = dma.hbm_to_vmem [thread:$0]  %s272_s0, 256, %s15_s7, [#allocation3]  }
  0x11   :  { %203 = dma.done.wait [#allocation3], 256  }
  0x12   :  { %204 = vsyncadd [#allocation3], 4294967040  ;;  %v29_v0 = vlaneseq  ;;  %v208_v1 = vmov 1983009808   ;;  %v232_v6 = vld [vmem:[#allocation2] sm:$0xff]  ;;  %v234_v7 = vld [vmem:[#allocation2 + $0x8] sm:$0xff] }
  0x13   :  { %v27_v2 = vunpack.c.l.s4 %v208_v1  ;;  %vm67_vm0 = vcmask 1041408   ;;  %v25_v8 = vcombine.high %v232_v6, %v232_v6  ;;  %v42_v10 = vcombine.high %v234_v7, %v234_v7  ;;  %s209_s24 = smov [#allocation5]  }
  0x14   :  { %v30_v3 = vshrl.u32 %v29_v0, 7  ;;  %s137_s25 = sshll.u32 %s209_s24, 4  ;;  %s138_s25 = int_to_ptr.vmem [resolvable:$true] %s137_s25 }
  0x15   :  { %v28_v4 = vunpack.c.0.s8 %v27_v2  ;;  %s181_s26 = scalar_lea.vmem %s138_s25, 256  ;;  %p186_p9 = scmp.lt.s32.totalorder %s138_s25, %s138_s25 }
  0x16   :  { %p182_p8 = scmp.ne.s32.totalorder %s138_s25, %s181_s26  ;;  %p187_p10 = scmp.lt.s32.totalorder %s181_s26, %s181_s26 }
  0x17   :  { %v31_v5 = vsub.s32 %v28_v4, %v30_v3 }
  0x18   :  { %p188_p11 = por %p187_p10, %p186_p9 }
  0x19   :  { %v32_v9 = vrot.slane %v232_v6, %v31_v5  ;;  %v49_v11 = vrot.slane %v234_v7, %v31_v5  ;;  %v39_v12 = vrot.slane %v25_v8, %v31_v5  ;;  %v56_v14 = vrot.slane %v42_v10, %v31_v5 }
  0x1a   :  { %p189_p12 = pnand %p188_p11, %p182_p8 }
  0x1b   :  { %v40_v13 = vcombine.high %v32_v9, %v32_v9  ;;  %v57_v15 = vcombine.high %v49_v11, %v49_v11  ;;  %v68_v16 = vsel %vm67_vm0, %v32_v9, inf  ;;  %v72_v17 = vsel %vm67_vm0, %v49_v11, inf }
  0x1c   :  { %v92_v18 = vsel %vm67_vm0, %v32_v9, -inf  ;;  %v96_v19 = vsel %vm67_vm0, %v49_v11, -inf  ;;  %v41_v20 = vcombine.high %v39_v12, %v39_v12  ;;  %v58_v21 = vcombine.high %v56_v14, %v56_v14 }
  0x1d   :  { %v69_v22 = vsel %vm67_vm0, %v40_v13, inf  ;;  %v70_v23 = vsel %vm67_vm0, %v39_v12, inf  ;;  %v73_v24 = vmin.f32 %v68_v16, %v72_v17  ;;  %v74_v25 = vsel %vm67_vm0, %v57_v15, inf }
  0x1e   :  { %v76_v26 = vsel %vm67_vm0, %v56_v14, inf  ;;  %v93_v27 = vsel %vm67_vm0, %v40_v13, -inf  ;;  %v71_v28 = vsel %vm67_vm0, %v41_v20, inf  ;;  %v75_v29 = vmin.f32 %v69_v22, %v74_v25 }
  0x1f   :  { %v77_v30 = vmin.f32 %v70_v23, %v76_v26  ;;  %v78_v31 = vsel %vm67_vm0, %v58_v21, inf  ;;  %v94_v33 = vsel %vm67_vm0, %v39_v12, -inf  ;;  %v95_v34 = vsel %vm67_vm0, %v41_v20, -inf }
  0x20   :  { %v79_v32 = vmin.f32 %v71_v28, %v78_v31  ;;  %v97_v35 = vmax.f32 %v92_v18, %v96_v19  ;;  %v80_v36 = vmin.f32 %v73_v24, %v75_v29  ;;  %v98_v37 = vsel %vm67_vm0, %v57_v15, -inf }
  0x21   :  { %v100_v38 = vsel %vm67_vm0, %v56_v14, -inf  ;;  %v102_v39 = vsel %vm67_vm0, %v58_v21, -inf  ;;  %v99_v41 = vmax.f32 %v93_v27, %v98_v37 }
  0x22   :  { %v81_v40 = vmin.f32 %v77_v30, %v79_v32  ;;  %v101_v42 = vmax.f32 %v94_v33, %v100_v38  ;;  %v103_v43 = vmax.f32 %v95_v34, %v102_v39 }
  0x23   :  { %v104_v45 = vmax.f32 %v97_v35, %v99_v41 }
  0x24   :  { %v82_v44 = vmin.f32 %v80_v36, %v81_v40  ;;  %v105_v46 = vmax.f32 %v101_v42, %v103_v43 }
  0x26   :  { %83 = vmin.xlane.f32.xlu0 %v82_v44  ;;  %v106_v47 = vmax.f32 %v104_v45, %v105_v46 }
  0x2a   :  { %107 = vmax.xlane.f32.xlu0 %v106_v47 }
  0xb3   :  { %v84_v48 = vpop.xlane.xlu0 %83 }
  0xb4   :  { %v85_v49 = vrot.slane %v84_v48, 4 }
  0xb6   :  { %v86_v50 = vmin.f32 %v84_v48, %v85_v49 }
  0xb7   :  { %v108_v51 = vpop.xlane.xlu0 %107 }
  0xb8   :  { %v87_v52 = vrot.slane %v86_v50, 2  ;;  %v109_v53 = vrot.slane %v108_v51, 4 }
  0xba   :  { %v110_v54 = vmax.f32 %v108_v51, %v109_v53  ;;  %v88_v55 = vmin.f32 %v86_v50, %v87_v52 }
  0xbc   :  { %v111_v56 = vrot.slane %v110_v54, 2  ;;  %v89_v57 = vrot.slane %v88_v55, 1 }
  0xbe   :  { %v112_v58 = vmax.f32 %v110_v54, %v111_v56  ;;  %v90_v59 = vmin.f32 %v88_v55, %v89_v57 }
  0xc0   :  { %146 = vpush %v90_v59  ;;  %v113_v60 = vrot.slane %v112_v58, 1 }
  0xc2   :  { %v114_v61 = vmax.f32 %v112_v58, %v113_v60 }
  0xc4   :  { %148 = vpush %v114_v61 }
  0xf1   :  { %s147_s0 = spop %146 }
  0xf5   :  { %s149_s18 = spop %148 }
  0xf6   :  { %s116_s19 = ssub.f32 %s149_s18, %s147_s0 }
  0xf8   :  { %v117_v62 = vstv %s116_s19 }
  0xf9   :  { %157 = vrcp.f32 %v117_v62 }
 0x103   :  { %v158_v63 = vpop.eup %157 }
 0x104   :  { %150 = vpush %v158_v63 }
 0x135   :  { %s151_s20 = spop %150 }
 0x136   :  { %s120_s21 = smul.f32 2.0, %s151_s20 }
 0x138   :  { %s121_s22 = smul.f32 %s147_s0, %s120_s21  ;;  %v123_v0 = vstv %s120_s21 }
 0x139   :  { %v124_v1 = vmul.f32 %v123_v0, %v232_v6  ;;  %v125_v2 = vmul.f32 %v123_v0, %v234_v7 }
 0x13a   :  { %s122_s23 = ssub.f32 -1.0, %s121_s22 }
 0x13c   :  { %v126_v3 = vstv %s122_s23 }
 0x13d   :  { %v127_v4 = vadd.f32 %v126_v3, %v124_v1  ;;  %v128_v5 = vadd.f32 %v126_v3, %v125_v2 }
 0x13f   :  { %129 = vst [vmem:[#allocation5] sm:$0xff] %v127_v4  ;;  %130 = vst [vmem:[#allocation5 + $0x8] sm:$0xff] %v128_v5 }
 0x140   :  { %192 = shalt.err (!%p189_p12)
}
 0x141   :  { %s193_s29 = scalar_lea.hbm %s273_s1, 256 }
 0x142   :  { %p194_p13 = scmp.ne.s32.totalorder %s273_s1, %s193_s29  ;;  %p197_p0 = scmp.lt.u32.totalorder %s193_s29, %s273_s1 }
 0x144   :  { %p199_p1 = pnand %p197_p0, %p194_p13 }
 0x146   :  { %202 = shalt.err (!%p199_p1)
}
 0x147   :  { %140 = dma.vmem_to_hbm [thread:$0]  %s138_s25, 256, %s273_s1, [#allocation4]  }
 0x148   :  { %205 = dma.done.wait [#allocation4], 256  }
 0x149   :  { %206 = vsyncadd [#allocation4], 4294967040 }
 0x14a   :  { %144 = vsyncpa [#allocation3], 1 }
 0x14b   :  { %145 = vsyncpa [#allocation4], 1 }

</bundles_post_ra>
